<compile_context>
chip_gen: v7x
topology: tpu7x:2x2x1
jax: 0.10.0
libtpu: 0.0.40
codegen_flags: <defaults>
</compile_context>

<pallas_src>
import functools

import jax
import jax.numpy as jnp
import numpy as np
from jax import lax
from jax.experimental import pallas as pl
from jax.experimental.pallas import tpu as pltpu

EPS = 1e-5


def _round_up(v, m):
    return (v + m - 1) // m * m


def _fold_bn(gamma, beta, mean, var):
    """Fold inference BN into per-channel scale/bias, flat (C,) float32."""
    s = gamma / jnp.sqrt(var + EPS)
    return s.astype(jnp.float32), (beta - mean * s).astype(jnp.float32)


def _conv3_band(w_oihw, W_in, stride, lane_width, dtype=jnp.bfloat16):
    """3x3 conv (padding=1, stride s) as a banded matrix over lane-packed rows.

    Activation rows are `lane_width` lanes: lane w*C_in + c holds column w (w < W_in);
    lanes [W_in*C_in, lane_width) are zero (they stand in for the w=-1 / w=W_in padding
    columns plus 128-lane alignment).  The matrix maps the concat of the kh=0,1,2
    row-taps (K = 3*lane_width) to W_out*C_out output lanes (lane wo*C_out + co).
    """
    C_out, C_in = int(w_oihw.shape[0]), int(w_oihw.shape[1])
    W_out = W_in // stride
    Wp = W_in + 2
    sel = np.zeros((3, Wp, W_out), np.float32)
    for kw in range(3):
        for wo in range(W_out):
            w = wo * stride + kw - 1
            lb = W_in if w < 0 else (W_in + 1 if w >= W_in else w)
            sel[kw, lb, wo] = 1.0
    w_hwio = jnp.transpose(w_oihw, (2, 3, 1, 0))                      # (3, 3, C_in, C_out)
    band = jnp.einsum('xqw,kxco->kqcwo', jnp.asarray(sel), w_hwio,
                      precision=lax.Precision.HIGHEST)                # (3, Wp, C_in, W_out, C_out)
    band = band.reshape(3, Wp * C_in, W_out * C_out)
    band = jnp.pad(band, ((0, 0), (0, lane_width - Wp * C_in), (0, 0)))
    return band.reshape(3 * lane_width, W_out * C_out).astype(dtype)


def _conv1_band(wsc_oihw, W_in, stride, lane_width, dtype=jnp.bfloat16):
    """1x1 strided conv as a banded matrix applied to the kh=1 lane-packed row tap."""
    C_out, C_in = int(wsc_oihw.shape[0]), int(wsc_oihw.shape[1])
    W_out = W_in // stride
    sel = np.zeros((lane_width // C_in if False else W_in + 2, W_out), np.float32)
    for wo in range(W_out):
        sel[wo * stride, wo] = 1.0
    wsc_io = wsc_oihw.reshape(C_out, C_in).T                          # (C_in, C_out)
    band = jnp.einsum('qw,co->qcwo', jnp.asarray(sel), wsc_io,
                      precision=lax.Precision.HIGHEST)                # (Wp, C_in, W_out, C_out)
    band = band.reshape((W_in + 2) * C_in, W_out * C_out)
    band = jnp.pad(band, ((0, lane_width - (W_in + 2) * C_in), (0, 0)))
    return band.astype(dtype)


def _preact_kernel(x_ref, s1_ref, b1_ref, w1_ref, s2_ref, b2_ref, w2_ref, wsc_ref,
                   o_ref, pad1_ref, pad2_ref, *,
                   H, W, Cin, Cout, stride, has_shortcut):
    """One image: relu(bn1) -> conv1(3x3,s) -> relu(bn2) -> conv2(3x3,1) + shortcut.

    All activations are lane-packed 2-D slabs (rows, W*C lanes); each conv is a single
    bf16 MXU matmul with f32 accumulation against a banded weight matrix.
    """
    Ho, Wo = H // stride, W // stride
    f32, bf16 = jnp.float32, jnp.bfloat16
    LP1 = pad1_ref.shape[1]          # padded/aligned lane width of conv1 input rows
    LP2 = pad2_ref.shape[1]          # padded/aligned lane width of conv2 input rows

    # ---- bn1 + relu in f32 (every lane carries data: W*Cin wide) ----
    x = x_ref[...]                                                    # (H, W*Cin) f32
    a = jnp.maximum(x * s1_ref[...] + b1_ref[...], 0.0)

    # ---- single padded scratch copy of relu(bn1(x)):
    #      rows 0 / H+1 are the H-halo, lanes [W*Cin, LP1) are the W-halo + alignment.
    #      Data store is lane-aligned (offset 0); only sublane offset 1 is unaligned. ----
    pad1_ref[0:1, :] = jnp.zeros((1, LP1), f32)
    pad1_ref[H + 1:H + 2, :] = jnp.zeros((1, LP1), f32)
    pad1_ref[:, W * Cin:LP1] = jnp.zeros((H + 2, LP1 - W * Cin), f32)
    pad1_ref[1:H + 1, 0:W * Cin] = a

    def rows1(kh):                   # rows kh + ho*stride of the padded slab
        if stride == 1:
            return pad1_ref[kh:kh + Ho, :]
        return pad1_ref[pl.ds(kh, Ho, stride), :]

    # ---- conv1: ONE bf16 MXU matmul, K = 3*LP1, f32 accumulation ----
    taps1 = [rows1(kh).astype(bf16) for kh in range(3)]               # 3 x (Ho, LP1)
    slab1 = jnp.concatenate(taps1, axis=-1)                           # (Ho, 3*LP1), 128-aligned chunks
    out1 = jnp.dot(slab1, w1_ref[...], preferred_element_type=f32)    # (Ho, Wo*Cout)

    # ---- bn2 + relu (fully lane-dense: Wo*Cout lanes) ----
    b = jnp.maximum(out1 * s2_ref[...] + b2_ref[...], 0.0)

    pad2_ref[0:1, :] = jnp.zeros((1, LP2), f32)
    pad2_ref[Ho + 1:Ho + 2, :] = jnp.zeros((1, LP2), f32)
    pad2_ref[:, Wo * Cout:LP2] = jnp.zeros((Ho + 2, LP2 - Wo * Cout), f32)
    pad2_ref[1:Ho + 1, 0:Wo * Cout] = b

    # ---- conv2 (3x3, stride 1): ONE bf16 MXU matmul, K = 3*LP2 ----
    slab2 = jnp.concatenate(
        [pad2_ref[kh:kh + Ho, :].astype(bf16) for kh in range(3)], axis=-1)
    out2 = jnp.dot(slab2, w2_ref[...], preferred_element_type=f32)    # (Ho, Wo*Cout)

    # ---- shortcut: 1x1 strided conv on relu(bn1(x)) (reuses the kh=1 tap of conv1),
    #      or the untouched f32 input for the identity case. ----
    if has_shortcut:
        sc = jnp.dot(taps1[1], wsc_ref[...], preferred_element_type=f32)
    else:
        sc = x                        # stride==1 and Cin==Cout -> same lane packing

    # Lane-dense output store: (Ho, Wo*Cout), no masked narrow vst.
    o_ref[...] = (out2 + sc).astype(o_ref.dtype)


def preact_block_forward(x_nchw, params, *, stride=1):
    """PyTorch-compatible wrapper: NCHW float32 in, NCHW float32 out."""
    N, Cin, H, W = x_nchw.shape
    Cout = params["w1"].shape[0]
    assert H % stride == 0 and W % stride == 0
    Ho, Wo = H // stride, W // stride
    has_shortcut = (stride != 1) or (Cin != Cout)

    # ---- glue: lane-packed layout + parameter folding (plain JAX, outside the kernel) ----
    # x stays f32 so the identity-shortcut residual path is not bf16-quantized.
    x2d = jnp.transpose(x_nchw, (0, 2, 3, 1)).reshape(N, H, W * Cin).astype(jnp.float32)

    s1c, b1c = _fold_bn(*params["bn1"])
    s2c, b2c = _fold_bn(*params["bn2"])
    s1t = jnp.tile(s1c, W).reshape(1, W * Cin)        # lane index = w*Cin + c
    b1t = jnp.tile(b1c, W).reshape(1, W * Cin)
    s2t = jnp.tile(s2c, Wo).reshape(1, Wo * Cout)     # lane index = wo*Cout + co
    b2t = jnp.tile(b2c, Wo).reshape(1, Wo * Cout)

    LP1 = _round_up((W + 2) * Cin, 128)               # conv1-input lane width (128-aligned)
    LP2 = _round_up((Wo + 2) * Cout, 128)             # conv2-input lane width
    w1b = _conv3_band(params["w1"], W, stride, LP1)                  # (3*LP1, Wo*Cout) bf16
    w2b = _conv3_band(params["w2"], Wo, 1, LP2)                      # (3*LP2, Wo*Cout) bf16
    if has_shortcut:
        wscb = _conv1_band(params["wsc"], W, stride, LP1)            # (LP1, Wo*Cout) bf16
    else:
        wscb = jnp.zeros((LP1, Wo * Cout), jnp.bfloat16)             # ignored by kernel

    kernel = functools.partial(_preact_kernel, H=H, W=W, Cin=Cin, Cout=Cout,
                               stride=stride, has_shortcut=has_shortcut)

    def full(arr):
        shp = arr.shape
        return pl.BlockSpec(shp, lambda n, _s=shp: (0,) * len(_s))

    # VMEM budget from the actual buffers (2x headroom), capped for v7x's 64 MiB.
    def nbytes(a):
        return int(np.prod(a.shape)) * a.dtype.itemsize
    block_bytes = 2 * (H * W * Cin * 4 + Ho * Wo * Cout * 4)          # double-buffered x / out
    operand_bytes = 2 * sum(nbytes(a) for a in (s1t, b1t, w1b, s2t, b2t, w2b, wscb))
    scratch_bytes = 4 * ((H + 2) * LP1 + (Ho + 2) * LP2)
    vmem_limit = int(min(64 * 1024 * 1024,
                         max(4 * 1024 * 1024,
                             2 * (block_bytes + operand_bytes + scratch_bytes))))

    out_packed = pl.pallas_call(
        kernel,
        out_shape=jax.ShapeDtypeStruct((N, Ho, Wo * Cout), jnp.float32),
        grid_spec=pltpu.PrefetchScalarGridSpec(
            num_scalar_prefetch=0,
            grid=(N,),
            in_specs=[
                pl.BlockSpec((None, H, W * Cin), lambda n: (n, 0, 0)),   # x (one image / step)
                full(s1t), full(b1t),                                    # bn1 scale / bias (tiled, f32)
                full(w1b),                                               # conv1 banded weights (bf16)
                full(s2t), full(b2t),                                    # bn2 scale / bias (tiled, f32)
                full(w2b),                                               # conv2 banded weights (bf16)
                full(wscb),                                              # shortcut banded weights (bf16)
            ],
            out_specs=pl.BlockSpec((None, Ho, Wo * Cout), lambda n: (n, 0, 0)),
            scratch_shapes=[
                pltpu.VMEM((H + 2, LP1), jnp.float32),     # padded relu(bn1(x)) (single copy)
                pltpu.VMEM((Ho + 2, LP2), jnp.float32),    # padded relu(bn2(conv1)) (single copy)
            ],
        ),
        compiler_params=pltpu.CompilerParams(
            dimension_semantics=("parallel",),
            vmem_limit_bytes=vmem_limit,
        ),
    )(x2d, s1t, b1t, w1b, s2t, b2t, w2b, wscb)

    out_nhwc = out_packed.reshape(N, Ho, Wo, Cout)
    return jnp.transpose(out_nhwc, (0, 3, 1, 2))                      # back to NCHW


def preact_block_reference_f32(x, params, *, stride=1):
    """Pure-JAX float32 (HIGHEST precision) reference, NCHW -- the module semantics."""
    Cin, Cout = x.shape[1], params["w1"].shape[0]
    has_shortcut = (stride != 1) or (Cin != Cout)

    def bn(t, g, b, m, v):
        inv = g / jnp.sqrt(v + EPS)
        return t * inv[None, :, None, None] + (b - m * inv)[None, :, None, None]

    conv = functools.partial(lax.conv_general_dilated,
                             dimension_numbers=("NCHW", "OIHW", "NCHW"),
                             precision=lax.Precision.HIGHEST)

    a = jax.nn.relu(bn(x, *params["bn1"]))
    sc = conv(a, params["wsc"], (stride, stride), "VALID") if has_shortcut else x
    out = conv(a, params["w1"], (stride, stride), ((1, 1), (1, 1)))
    out = jax.nn.relu(bn(out, *params["bn2"]))
    out = conv(out, params["w2"], (1, 1), ((1, 1), (1, 1)))
    return out + sc


def preact_block_reference_bf16(x, params, *, stride=1):
    """Pure-JAX reference matching the kernel's bf16 matmul inputs / f32 accumulation."""
    Cin, Cout = x.shape[1], params["w1"].shape[0]
    has_shortcut = (stride != 1) or (Cin != Cout)
    bf16, f32 = jnp.bfloat16, jnp.float32

    x_nhwc = jnp.transpose(x, (0, 2, 3, 1)).astype(f32)
    s1, b1 = _fold_bn(*params["bn1"])
    s2, b2 = _fold_bn(*params["bn2"])
    w1 = jnp.transpose(params["w1"], (2, 3, 1, 0)).astype(bf16)       # HWIO
    w2 = jnp.transpose(params["w2"], (2, 3, 1, 0)).astype(bf16)

    conv = functools.partial(lax.conv_general_dilated,
                             dimension_numbers=("NHWC", "HWIO", "NHWC"),
                             preferred_element_type=f32)

    a = jnp.maximum(x_nhwc * s1[None, None, None, :] + b1[None, None, None, :], 0.0).astype(bf16)
    if has_shortcut:
        wsc = jnp.transpose(params["wsc"], (2, 3, 1, 0)).astype(bf16)
        sc = conv(a, wsc, (stride, stride), "VALID")
    else:
        sc = x_nhwc                                                   # f32 identity residual
    out = conv(a, w1, (stride, stride), ((1, 1), (1, 1)))
    out = jnp.maximum(out * s2[None, None, None, :] + b2[None, None, None, :], 0.0).astype(bf16)
    out = conv(out, w2, (1, 1), ((1, 1), (1, 1)))
    return jnp.transpose(out + sc, (0, 3, 1, 2))                      # NCHW f32


if __name__ == "__main__":
    N, Cin, Cout, H, W, stride = 2, 4, 8, 16, 16, 1

    key = jax.random.PRNGKey(0)
    ks = jax.random.split(key, 12)
    x = jax.random.normal(ks[0], (N, Cin, H, W), jnp.float32)
    params = {
        # (gamma, beta, running_mean, running_var)
        "bn1": (jax.random.uniform(ks[1], (Cin,), jnp.float32, 0.5, 1.5),
                0.1 * jax.random.normal(ks[2], (Cin,), jnp.float32),
                0.1 * jax.random.normal(ks[3], (Cin,), jnp.float32),
                jax.random.uniform(ks[4], (Cin,), jnp.float32, 0.5, 1.5)),
        "w1": 0.2 * jax.random.normal(ks[5], (Cout, Cin, 3, 3), jnp.float32),
        "bn2": (jax.random.uniform(ks[6], (Cout,), jnp.float32, 0.5, 1.5),
                0.1 * jax.random.normal(ks[7], (Cout,), jnp.float32),
                0.1 * jax.random.normal(ks[8], (Cout,), jnp.float32),
                jax.random.uniform(ks[9], (Cout,), jnp.float32, 0.5, 1.5)),
        "w2": 0.2 * jax.random.normal(ks[10], (Cout, Cout, 3, 3), jnp.float32),
        "wsc": 0.2 * jax.random.normal(ks[11], (Cout, Cin, 1, 1), jnp.float32),
    }

    out = jax.block_until_ready(preact_block_forward(x, params, stride=stride))
    assert out.shape == (N, Cout, H // stride, W // stride)

    # Kernel-logic check vs. a matched-precision (bf16 matmul inputs, f32 acc) reference.
    ref_matched = jax.block_until_ready(preact_block_reference_bf16(x, params, stride=stride))
    np.testing.assert_allclose(np.asarray(out), np.asarray(ref_matched), rtol=2e-2, atol=2e-2)

    # End-to-end check vs. the full-f32 module semantics (loose: bf16 MXU quantization).
    ref_f32 = jax.block_until_ready(preact_block_reference_f32(x, params, stride=stride))
    np.testing.assert_allclose(np.asarray(out), np.asarray(ref_f32), rtol=5e-2, atol=1e-1)

    print("KERNEL_OK")
</pallas_src>

<mosaic_0001>
module attributes {stable_mosaic.version = 11 : i64} {
  func.func @_preact_kernel(%arg0: i32, %arg1: memref<1x16x64xf32, #tpu.memory_space<vmem>>, %arg2: memref<1x64xf32, #tpu.memory_space<vmem>>, %arg3: memref<1x64xf32, #tpu.memory_space<vmem>>, %arg4: memref<384x128xbf16, #tpu.memory_space<vmem>>, %arg5: memref<1x128xf32, #tpu.memory_space<vmem>>, %arg6: memref<1x128xf32, #tpu.memory_space<vmem>>, %arg7: memref<768x128xbf16, #tpu.memory_space<vmem>>, %arg8: memref<128x128xbf16, #tpu.memory_space<vmem>>, %arg9: memref<1x16x128xf32, #tpu.memory_space<vmem>>, %arg10: memref<18x128xf32, #tpu.memory_space<vmem>>, %arg11: memref<18x256xf32, #tpu.memory_space<vmem>>) attributes {dimension_semantics = [#tpu.dimension_semantics<parallel>], iteration_bounds = array<i64: 2>, scalar_prefetch = 0 : i64, scratch_operands = 2 : i64, tpu.core_type = #tpu.core_type<tc>, window_params = [{transform_indices = @transform_0, window_bounds = array<i64: 1, 16, 64>}, {pipeline_mode = #tpu.pipeline_mode<synchronous>, transform_indices = @transform_1, window_bounds = array<i64: 1, 64>}, {pipeline_mode = #tpu.pipeline_mode<synchronous>, transform_indices = @transform_2, window_bounds = array<i64: 1, 64>}, {pipeline_mode = #tpu.pipeline_mode<synchronous>, transform_indices = @transform_3, window_bounds = array<i64: 384, 128>}, {pipeline_mode = #tpu.pipeline_mode<synchronous>, transform_indices = @transform_4, window_bounds = array<i64: 1, 128>}, {pipeline_mode = #tpu.pipeline_mode<synchronous>, transform_indices = @transform_5, window_bounds = array<i64: 1, 128>}, {pipeline_mode = #tpu.pipeline_mode<synchronous>, transform_indices = @transform_6, window_bounds = array<i64: 768, 128>}, {pipeline_mode = #tpu.pipeline_mode<synchronous>, transform_indices = @transform_7, window_bounds = array<i64: 128, 128>}, {transform_indices = @transform_8, window_bounds = array<i64: 1, 16, 128>}]} {
    %c0 = arith.constant 0 : index
    %c0_0 = arith.constant 0 : index
    %c0_1 = arith.constant 0 : index
    %0 = vector.load %arg1[%c0, %c0_0, %c0_1] : memref<1x16x64xf32, #tpu.memory_space<vmem>>, vector<1x16x64xf32>
    %1 = vector.shape_cast %0 : vector<1x16x64xf32> to vector<16x64xf32>
    %c0_2 = arith.constant 0 : index
    %c0_3 = arith.constant 0 : index
    %2 = vector.load %arg2[%c0_2, %c0_3] : memref<1x64xf32, #tpu.memory_space<vmem>>, vector<1x64xf32>
    %3 = vector.broadcast %2 : vector<1x64xf32> to vector<16x64xf32>
    %4 = arith.mulf %1, %3 : vector<16x64xf32>
    %c0_4 = arith.constant 0 : index
    %c0_5 = arith.constant 0 : index
    %5 = vector.load %arg3[%c0_4, %c0_5] : memref<1x64xf32, #tpu.memory_space<vmem>>, vector<1x64xf32>
    %6 = vector.broadcast %5 : vector<1x64xf32> to vector<16x64xf32>
    %7 = arith.addf %4, %6 : vector<16x64xf32>
    %cst = arith.constant 0.000000e+00 : f32
    %8 = vector.broadcast %cst : f32 to vector<16x64xf32>
    %9 = arith.maximumf %7, %8 : vector<16x64xf32>
    %cst_6 = arith.constant 0.000000e+00 : f32
    %10 = vector.broadcast %cst_6 : f32 to vector<1x128xf32>
    %c0_7 = arith.constant 0 : index
    %c0_8 = arith.constant 0 : index
    %11 = vector.load %arg10[%c0_7, %c0_8] : memref<18x128xf32, #tpu.memory_space<vmem>>, vector<1x128xf32>
    tpu.vector_store %arg10[%c0_7, %c0_8], %10 {strides = array<i32>} : memref<18x128xf32, #tpu.memory_space<vmem>>, vector<1x128xf32>,
    %cst_9 = arith.constant 0.000000e+00 : f32
    %12 = vector.broadcast %cst_9 : f32 to vector<1x128xf32>
    %c17 = arith.constant 17 : index
    %c0_10 = arith.constant 0 : index
    %13 = vector.load %arg10[%c17, %c0_10] : memref<18x128xf32, #tpu.memory_space<vmem>>, vector<1x128xf32>
    tpu.vector_store %arg10[%c17, %c0_10], %12 {strides = array<i32>} : memref<18x128xf32, #tpu.memory_space<vmem>>, vector<1x128xf32>,
    %cst_11 = arith.constant 0.000000e+00 : f32
    %14 = vector.broadcast %cst_11 : f32 to vector<18x64xf32>
    %c0_12 = arith.constant 0 : index
    %c64 = arith.constant 64 : index
    %15 = vector.load %arg10[%c0_12, %c64] : memref<18x128xf32, #tpu.memory_space<vmem>>, vector<18x64xf32>
    tpu.vector_store %arg10[%c0_12, %c64], %14 {strides = array<i32>} : memref<18x128xf32, #tpu.memory_space<vmem>>, vector<18x64xf32>,
    %c1 = arith.constant 1 : index
    %c0_13 = arith.constant 0 : index
    %16 = vector.load %arg10[%c1, %c0_13] : memref<18x128xf32, #tpu.memory_space<vmem>>, vector<16x64xf32>
    tpu.vector_store %arg10[%c1, %c0_13], %9 {strides = array<i32>} : memref<18x128xf32, #tpu.memory_space<vmem>>, vector<16x64xf32>,
    %c0_14 = arith.constant 0 : index
    %c0_15 = arith.constant 0 : index
    %17 = vector.load %arg10[%c0_14, %c0_15] : memref<18x128xf32, #tpu.memory_space<vmem>>, vector<16x128xf32>
    %18 = arith.truncf %17 : vector<16x128xf32> to vector<16x128xbf16>
    %c1_16 = arith.constant 1 : index
    %c0_17 = arith.constant 0 : index
    %19 = vector.load %arg10[%c1_16, %c0_17] : memref<18x128xf32, #tpu.memory_space<vmem>>, vector<16x128xf32>
    %20 = arith.truncf %19 : vector<16x128xf32> to vector<16x128xbf16>
    %c2 = arith.constant 2 : index
    %c0_18 = arith.constant 0 : index
    %21 = vector.load %arg10[%c2, %c0_18] : memref<18x128xf32, #tpu.memory_space<vmem>>, vector<16x128xf32>
    %22 = arith.truncf %21 : vector<16x128xf32> to vector<16x128xbf16>
    %23 = tpu.concatenate %18, %20, %22 in 1 : vector<16x128xbf16>, vector<16x128xbf16>, vector<16x128xbf16> -> vector<16x384xbf16>
    %c0_19 = arith.constant 0 : index
    %c0_20 = arith.constant 0 : index
    %24 = vector.load %arg4[%c0_19, %c0_20] : memref<384x128xbf16, #tpu.memory_space<vmem>>, vector<384x128xbf16>
    %cst_21 = arith.constant dense<0.000000e+00> : vector<16x128xf32>
    %25 = tpu.matmul %23, %24, %cst_21 {dimension_numbers = #tpu.dot_dimension_numbers<[1], [0], [0], [1], [0, 0, 1, 1], [], []>} : vector<16x384xbf16>, vector<384x128xbf16>, vector<16x128xf32> -> vector<16x128xf32>
    %c0_22 = arith.constant 0 : index
    %c0_23 = arith.constant 0 : index
    %26 = vector.load %arg5[%c0_22, %c0_23] : memref<1x128xf32, #tpu.memory_space<vmem>>, vector<1x128xf32>
    %27 = vector.broadcast %26 : vector<1x128xf32> to vector<16x128xf32>
    %28 = arith.mulf %25, %27 : vector<16x128xf32>
    %c0_24 = arith.constant 0 : index
    %c0_25 = arith.constant 0 : index
    %29 = vector.load %arg6[%c0_24, %c0_25] : memref<1x128xf32, #tpu.memory_space<vmem>>, vector<1x128xf32>
    %30 = vector.broadcast %29 : vector<1x128xf32> to vector<16x128xf32>
    %31 = arith.addf %28, %30 : vector<16x128xf32>
    %cst_26 = arith.constant 0.000000e+00 : f32
    %32 = vector.broadcast %cst_26 : f32 to vector<16x128xf32>
    %33 = arith.maximumf %31, %32 : vector<16x128xf32>
    %cst_27 = arith.constant 0.000000e+00 : f32
    %34 = vector.broadcast %cst_27 : f32 to vector<1x256xf32>
    %c0_28 = arith.constant 0 : index
    %c0_29 = arith.constant 0 : index
    %35 = vector.load %arg11[%c0_28, %c0_29] : memref<18x256xf32, #tpu.memory_space<vmem>>, vector<1x256xf32>
    tpu.vector_store %arg11[%c0_28, %c0_29], %34 {strides = array<i32>} : memref<18x256xf32, #tpu.memory_space<vmem>>, vector<1x256xf32>,
    %cst_30 = arith.constant 0.000000e+00 : f32
    %36 = vector.broadcast %cst_30 : f32 to vector<1x256xf32>
    %c17_31 = arith.constant 17 : index
    %c0_32 = arith.constant 0 : index
    %37 = vector.load %arg11[%c17_31, %c0_32] : memref<18x256xf32, #tpu.memory_space<vmem>>, vector<1x256xf32>
    tpu.vector_store %arg11[%c17_31, %c0_32], %36 {strides = array<i32>} : memref<18x256xf32, #tpu.memory_space<vmem>>, vector<1x256xf32>,
    %cst_33 = arith.constant 0.000000e+00 : f32
    %38 = vector.broadcast %cst_33 : f32 to vector<18x128xf32>
    %c0_34 = arith.constant 0 : index
    %c128 = arith.constant 128 : index
    %39 = vector.load %arg11[%c0_34, %c128] : memref<18x256xf32, #tpu.memory_space<vmem>>, vector<18x128xf32>
    tpu.vector_store %arg11[%c0_34, %c128], %38 {strides = array<i32>} : memref<18x256xf32, #tpu.memory_space<vmem>>, vector<18x128xf32>,
    %c1_35 = arith.constant 1 : index
    %c0_36 = arith.constant 0 : index
    %40 = vector.load %arg11[%c1_35, %c0_36] : memref<18x256xf32, #tpu.memory_space<vmem>>, vector<16x128xf32>
    tpu.vector_store %arg11[%c1_35, %c0_36], %33 {strides = array<i32>} : memref<18x256xf32, #tpu.memory_space<vmem>>, vector<16x128xf32>,
    %c0_37 = arith.constant 0 : index
    %c0_38 = arith.constant 0 : index
    %41 = vector.load %arg11[%c0_37, %c0_38] : memref<18x256xf32, #tpu.memory_space<vmem>>, vector<16x256xf32>
    %42 = arith.truncf %41 : vector<16x256xf32> to vector<16x256xbf16>
    %c1_39 = arith.constant 1 : index
    %c0_40 = arith.constant 0 : index
    %43 = vector.load %arg11[%c1_39, %c0_40] : memref<18x256xf32, #tpu.memory_space<vmem>>, vector<16x256xf32>
    %44 = arith.truncf %43 : vector<16x256xf32> to vector<16x256xbf16>
    %c2_41 = arith.constant 2 : index
    %c0_42 = arith.constant 0 : index
    %45 = vector.load %arg11[%c2_41, %c0_42] : memref<18x256xf32, #tpu.memory_space<vmem>>, vector<16x256xf32>
    %46 = arith.truncf %45 : vector<16x256xf32> to vector<16x256xbf16>
    %47 = tpu.concatenate %42, %44, %46 in 1 : vector<16x256xbf16>, vector<16x256xbf16>, vector<16x256xbf16> -> vector<16x768xbf16>
    %c0_43 = arith.constant 0 : index
    %c0_44 = arith.constant 0 : index
    %48 = vector.load %arg7[%c0_43, %c0_44] : memref<768x128xbf16, #tpu.memory_space<vmem>>, vector<768x128xbf16>
    %cst_45 = arith.constant dense<0.000000e+00> : vector<16x128xf32>
    %49 = tpu.matmul %47, %48, %cst_45 {dimension_numbers = #tpu.dot_dimension_numbers<[1], [0], [0], [1], [0, 0, 1, 1], [], []>} : vector<16x768xbf16>, vector<768x128xbf16>, vector<16x128xf32> -> vector<16x128xf32>
    %c0_46 = arith.constant 0 : index
    %c0_47 = arith.constant 0 : index
    %50 = vector.load %arg8[%c0_46, %c0_47] : memref<128x128xbf16, #tpu.memory_space<vmem>>, vector<128x128xbf16>
    %cst_48 = arith.constant dense<0.000000e+00> : vector<16x128xf32>
    %51 = tpu.matmul %20, %50, %cst_48 {dimension_numbers = #tpu.dot_dimension_numbers<[1], [0], [0], [1], [0, 0, 1, 1], [], []>} : vector<16x128xbf16>, vector<128x128xbf16>, vector<16x128xf32> -> vector<16x128xf32>
    %52 = arith.addf %49, %51 : vector<16x128xf32>
    %c0_49 = arith.constant 0 : index
    %c0_50 = arith.constant 0 : index
    %c0_51 = arith.constant 0 : index
    %53 = vector.load %arg9[%c0_49, %c0_50, %c0_51] : memref<1x16x128xf32, #tpu.memory_space<vmem>>, vector<1x16x128xf32>
    %54 = vector.shape_cast %53 : vector<1x16x128xf32> to vector<16x128xf32>
    %55 = vector.shape_cast %52 : vector<16x128xf32> to vector<1x16x128xf32>
    tpu.vector_store %arg9[%c0_49, %c0_50, %c0_51], %55 {strides = array<i32>} : memref<1x16x128xf32, #tpu.memory_space<vmem>>, vector<1x16x128xf32>,
    return
  }
  func.func @transform_0(%arg0: i32) -> (i32, i32, i32) {
    %c0_i32 = arith.constant 0 : i32
    %c0_i32_0 = arith.constant 0 : i32
    %c0_i32_1 = arith.constant 0 : i32
    return %arg0, %c0_i32, %c0_i32_0 : i32, i32, i32
  }
  func.func @transform_1(%arg0: i32) -> (i32, i32) {
    %c0_i32 = arith.constant 0 : i32
    %c0_i32_0 = arith.constant 0 : i32
    %c0_i32_1 = arith.constant 0 : i32
    return %c0_i32, %c0_i32_0 : i32, i32
  }
  func.func @transform_2(%arg0: i32) -> (i32, i32) {
    %c0_i32 = arith.constant 0 : i32
    %c0_i32_0 = arith.constant 0 : i32
    %c0_i32_1 = arith.constant 0 : i32
    return %c0_i32, %c0_i32_0 : i32, i32
  }
  func.func @transform_3(%arg0: i32) -> (i32, i32) {
    %c0_i32 = arith.constant 0 : i32
    %c0_i32_0 = arith.constant 0 : i32
    %c0_i32_1 = arith.constant 0 : i32
    return %c0_i32, %c0_i32_0 : i32, i32
  }
  func.func @transform_4(%arg0: i32) -> (i32, i32) {
    %c0_i32 = arith.constant 0 : i32
    %c0_i32_0 = arith.constant 0 : i32
    %c0_i32_1 = arith.constant 0 : i32
    return %c0_i32, %c0_i32_0 : i32, i32
  }
  func.func @transform_5(%arg0: i32) -> (i32, i32) {
    %c0_i32 = arith.constant 0 : i32
    %c0_i32_0 = arith.constant 0 : i32
    %c0_i32_1 = arith.constant 0 : i32
    return %c0_i32, %c0_i32_0 : i32, i32
  }
  func.func @transform_6(%arg0: i32) -> (i32, i32) {
    %c0_i32 = arith.constant 0 : i32
    %c0_i32_0 = arith.constant 0 : i32
    %c0_i32_1 = arith.constant 0 : i32
    return %c0_i32, %c0_i32_0 : i32, i32
  }
  func.func @transform_7(%arg0: i32) -> (i32, i32) {
    %c0_i32 = arith.constant 0 : i32
    %c0_i32_0 = arith.constant 0 : i32
    %c0_i32_1 = arith.constant 0 : i32
    return %c0_i32, %c0_i32_0 : i32, i32
  }
  func.func @transform_8(%arg0: i32) -> (i32, i32, i32) {
    %c0_i32 = arith.constant 0 : i32
    %c0_i32_0 = arith.constant 0 : i32
    %c0_i32_1 = arith.constant 0 : i32
    return %arg0, %c0_i32, %c0_i32_0 : i32, i32, i32
  }
}

</mosaic_0001>

<bundles_post_ra>
// kernel: tpu_custom_call.1
= control target key start
LH: loop header
LB: loop body
LE: loop exit
PB: predicated region body
PF: predicated region fallthrough
CT: control target
= control target key end

     0   :  { %13 = vsyncpa [#allocation5], 0  ;;  %s2509_s0 = inlined_call_operand.hbm [shape: f32[2,16,64], index: 0, kind: input, shape index: {}]   ;;  %s2510_s1 = inlined_call_operand.vmem [shape: f32[1,64], index: 1, kind: input, shape index: {}]   ;;  %s2511_s2 = inlined_call_operand.vmem [shape: f32[1,64], index: 2, kind: input, shape index: {}]   ;;  %s2512_s3 = inlined_call_operand.hbm [shape: bf16[384,128], index: 3, kind: input, shape index: {}]   ;;  %s2513_s4 = inlined_call_operand.vmem [shape: f32[1,128], index: 4, kind: input, shape index: {}]   ;;  %s2514_s5 = inlined_call_operand.vmem [shape: f32[1,128], index: 5, kind: input, shape index: {}]   ;;  %s2515_s6 = inlined_call_operand.hbm [shape: bf16[768,128], index: 6, kind: input, shape index: {}]   ;;  %s2516_s7 = inlined_call_operand.hbm [shape: bf16[128,128], index: 7, kind: input, shape index: {}]   ;;  %s2517_s8 = inlined_call_operand.hbm [shape: f32[2,16,128], index: 8, kind: output, shape index: {}]  }
   0x1   :  { %15 = vsyncpa [#allocation5 + $0x1], 0 }
   0x2   :  { %16 = vsyncpa [#allocation8], 0 }
   0x3   :  { %17 = vsyncpa [#allocation11], 0 }
   0x4   :  { %18 = vsyncpa [#allocation6], 0 }
   0x5   :  { %20 = vsyncpa [#allocation6 + $0x1], 0  ;;  %s2186_s27 = smov 0   ;;  %s2188_s28 = smov 0  }
   0x6   :  { %s2190_s29 = smov 0   ;;  %s2192_s30 = smov 0  }
   0x7 LB: > { %2523 = sst [smem:[#allocation17_spill]] %s2113_s27  ;;  %s2207_s9 = sadd.s32 4294967295, %s2125_s30   ;;  %s2125_s30 = sphi %s2192_s30, %s2546_s30   ;;  %s2121_s29 = sphi %s2190_s29, %s2545_s29   ;;  %s2117_s28 = sphi %s2188_s28, %s2544_s28   ;;  %s2113_s27 = sphi %s2186_s27, %s2543_s27  }
   0x8   : > { %s1520_s10 = sadd.s32 4294967294, %s2125_s30   ;;  %p46_p0 = scmp.ne.s32.totalorder %s2117_s28, %s2113_s27 }
   0x9   : > { %p2518_p1 = scmp.eq.s32.totalorder %s2207_s9, 0  ;;  %p223_p3 = scmp.eq.s32.totalorder %s1520_s10, 1 }
   0xa   : > { %p1521_p5 = scmp.ge.s32.totalorder %s2125_s30, 1  ;;  %p230_p7 = scmp.lt.s32.totalorder %s2125_s30, 3 }
   0xb   : > { %p2216_p4 = por %p2518_p1, %p46_p0  ;;  %p2221_p6 = por %p223_p3, %p46_p0 }
   0xc   : > { %p2226_p8 = pnand %p1521_p5, %p230_p7  ;;  %s2127_s14 = smov [#allocation7]  }
   0xd   : > { %s2524_s11 = scalar_select %p2216_p4, 1, 0 }
   0xe   : > { %s2525_s12 = scalar_select %p2221_p6, 1, 0 }
   0xf   : > { %s2527_s13 = scalar_select %p2226_p8, 1, 0 }
  0x10   : > { %2526 = sst [smem:[#allocation18_spill]] %s2525_s12  ;;  %s248_s15 = sshll.u32 %s2127_s14, 4  ;;  %s2230_s15 = int_to_ptr.vmem [resolvable:$true] %s248_s15 }
  0x11   : > { %p1788_p9 = pneg %p2226_p8  ;;  %s2128_s17 = smov [#allocation9]  }
  0x12   : > { %s267_s18 = sshll.u32 %s2128_s17, 4  ;;  %s2129_s19 = smov [#allocation10]   ;;  %s2241_s18 = int_to_ptr.vmem [resolvable:$true] %s267_s18 }
  0x13   : > { %p2237_p11 = pnand %p1788_p9, %p2518_p1  ;;  %s2243_s20 = sshll.u32 %s2129_s19, 4  ;;  %s281_s20 = int_to_ptr.vmem [resolvable:$true] %s2243_s20 }
  0x14   : > { %s1937_s23 = scalar_lea.hbm %s2512_s3, 3072 }
  0x15   : > { %p1938_p12 = scmp.ne.s32.totalorder %s2512_s3, %s1937_s23  ;;  %p2253_p13 = pneg %p2237_p11 }
  0x16   : > { %p1944_p5 = scmp.lt.u32.totalorder %s1937_s23, %s2512_s3 }
  0x17   : > { %p1940_p0 = pnand %p2253_p13, %p1938_p12 }
  0x19   : > { %p1941_p3 = pneg %p1940_p0 }
  0x1b   : > { %p1946_p7 = pnand %p1944_p5, %p1941_p3 }
  0x1d   : > { %1949 = shalt.err (!%p1946_p7)
}
  0x1e   : > { %s1950_s17 = scalar_lea.vmem %s2230_s15, 3072  ;;  %p1958_p2 = scmp.lt.s32.totalorder %s2230_s15, %s2230_s15 }
  0x1f   : > { %p1951_p9 = scmp.ne.s32.totalorder %s2230_s15, %s1950_s17  ;;  %p1959_p6 = scmp.lt.s32.totalorder %s1950_s17, %s1950_s17 }
  0x21   : > { %p1953_p10 = pnand %p1951_p9, %p2253_p13  ;;  %p1960_p12 = por %p1959_p6, %p1958_p2 }
  0x23   : > { %p1954_p1 = pneg %p1953_p10 }
  0x25   : > { %p1961_p0 = pnand %p1960_p12, %p1954_p1 }
  0x27   : > { %1964 = shalt.err (!%p1961_p0)
}
  0x28   : > { %s2130_s19 = smov 64   ;;  %s2131_s21 = smov 4  }
  0x29   : > { %1791 = dma.hbm_to_vmem [thread:$0]  (!%p2237_p11), %s2512_s3, 3072, %s2230_s15, [#allocation8], %s2130_s19, %s2130_s19, %s2131_s21  }
  0x2a   : > { %s1965_s10 = scalar_lea.hbm %s2515_s6, 6144 }
  0x2b   : > { %p1966_p1 = scmp.ne.s32.totalorder %s2515_s6, %s1965_s10  ;;  %p1972_p10 = scmp.lt.u32.totalorder %s1965_s10, %s2515_s6 }
  0x2d   : > { %p1968_p2 = pnand %p1966_p1, %p2253_p13 }
  0x2f   : > { %p1969_p6 = pneg %p1968_p2 }
  0x31   : > { %p1974_p3 = pnand %p1972_p10, %p1969_p6 }
  0x33   : > { %1977 = shalt.err (!%p1974_p3)
}
  0x34   : > { %s1978_s15 = scalar_lea.vmem %s2241_s18, 6144  ;;  %p1986_p12 = scmp.lt.s32.totalorder %s2241_s18, %s2241_s18 }
  0x35   : > { %p1979_p5 = scmp.ne.s32.totalorder %s2241_s18, %s1978_s15  ;;  %p1987_p0 = scmp.lt.s32.totalorder %s1978_s15, %s1978_s15 }
  0x37   : > { %p1981_p7 = pnand %p1979_p5, %p2253_p13  ;;  %p1988_p1 = por %p1987_p0, %p1986_p12 }
  0x39   : > { %p1982_p9 = pneg %p1981_p7 }
  0x3b   : > { %p1989_p2 = pnand %p1988_p1, %p1982_p9 }
  0x3d   : > { %1992 = shalt.err (!%p1989_p2)
}
  0x3e   : > { %1794 = dma.hbm_to_vmem [thread:$0]  (!%p2237_p11), %s2515_s6, 6144, %s2241_s18, [#allocation8], %s2130_s19, %s2130_s19, %s2131_s21  }
  0x3f   : > { %s1993_s24 = scalar_lea.hbm %s2516_s7, 1024 }
  0x40   : > { %p1994_p6 = scmp.ne.s32.totalorder %s2516_s7, %s1993_s24  ;;  %p2000_p5 = scmp.lt.u32.totalorder %s1993_s24, %s2516_s7 }
  0x42   : > { %p1996_p10 = pnand %p1994_p6, %p2253_p13 }
  0x44   : > { %p1997_p3 = pneg %p1996_p10 }
  0x46   : > { %p2002_p7 = pnand %p2000_p5, %p1997_p3 }
  0x48   : > { %2005 = shalt.err (!%p2002_p7)
}
  0x49   : > { %s2006_s15 = scalar_lea.vmem %s281_s20, 1024  ;;  %p2014_p1 = scmp.lt.s32.totalorder %s281_s20, %s281_s20 }
  0x4a   : > { %p2007_p9 = scmp.ne.s32.totalorder %s281_s20, %s2006_s15  ;;  %p2015_p2 = scmp.lt.s32.totalorder %s2006_s15, %s2006_s15 }
  0x4c   : > { %p2009_p12 = pnand %p2007_p9, %p2253_p13  ;;  %p2016_p4 = por %p2015_p2, %p2014_p1 }
  0x4e   : > { %p2010_p0 = pneg %p2009_p12 }
  0x50   : > { %p2017_p8 = pnand %p2016_p4, %p2010_p0 }
  0x52   : > { %2020 = shalt.err (!%p2017_p8)
}
  0x53   : > { %1797 = dma.hbm_to_vmem [thread:$0]  (!%p2237_p11), %s2516_s7, 1024, %s281_s20, [#allocation11], %s2130_s19, %s2130_s19, %s2131_s21  }
  0x54   : > { %s2326_s26 = sadd.s32 1, %s2125_s30   ;;  %s33_s12 = sadd.s32 1, %s2121_s29 }
  0x55   : > { %s30_s16 = ssub.s32 %s2125_s30, %s2326_s26  ;;  %p40_p8 = scmp.ne.s32.totalorder %s2121_s29, %s2117_s28 }
  0x56   : > { %p31_p4 = scmp.eq.s32.totalorder %s30_s16, 0  ;;  %p41_p13 = scmp.eq.s32.totalorder %s2125_s30, 0 }
  0x57   : > { %p1809_p6 = scmp.lt.s32.totalorder %s2125_s30, 2  ;;  %p2530_p3 = scmp.eq.s32.totalorder %s2207_s9, 1 }
  0x58   : > { %s2336_s22 = scalar_select %p31_p4, %s2121_s29, %s33_s12  }
  0x59   : > { %p42_p10 = por %p41_p13, %p40_p8  ;;  %p2340_p5 = por %p2530_p3, %p40_p8 }
  0x5a   : > { %s294_s24 = sand.u32 1, %s2121_s29   ;;  %s1624_s25 = sshll.u32 %s2125_s30, 8 }
  0x5b   : > { %s1526_s20 = sshll.u32 %s294_s24, 4  ;;  %s2349_s10 = scalar_lea.hbm %s2509_s0, %s1624_s25 }
  0x5c   : > { %s298_s14 = scalar_lea.vmem [#allocation4], %s1526_s20  ;;  %p2351_p11 = pnand %p1809_p6, %p42_p10 }
  0x5d   : > { %s305_s17 = sshll.u32 %s298_s14, 4  ;;  %s2357_s18 = scalar_lea.sflag [#allocation5], %s294_s24  ;;  %s2355_s17 = int_to_ptr.vmem [resolvable:$true] %s305_s17 }
  0x5e   : > { %s2021_s27 = scalar_lea.hbm %s2349_s10, 256  ;;  %p2023_p9 = pneg %p2351_p11 }
  0x5f   : > { %p2022_p7 = scmp.ne.s32.totalorder %s2349_s10, %s2021_s27  ;;  %s2026_s25 = scalar_lea.hbm %s2509_s0, 512 }
  0x60   : > { %p2027_p1 = scmp.lt.u32.totalorder %s2349_s10, %s2509_s0  ;;  %p2028_p2 = scmp.lt.u32.totalorder %s2026_s25, %s2021_s27 }
  0x61   : > { %p2024_p12 = pnand %p2023_p9, %p2022_p7  ;;  %p2030_p8 = scmp.lt.u32.totalorder %s2021_s27, %s2349_s10 }
  0x62   : > { %p2029_p4 = por %p2028_p2, %p2027_p1 }
  0x63   : > { %p2025_p0 = pneg %p2024_p12 }
  0x64   : > { %p2031_p13 = por %p2030_p8, %p2029_p4 }
  0x66   : > { %p2032_p6 = pnand %p2031_p13, %p2025_p0 }
  0x68   : > { %2035 = shalt.err (!%p2032_p6)
}
  0x69   : > { %s2036_s24 = scalar_lea.vmem %s2355_s17, 256  ;;  %s2132_s21 = smov [#allocation4]  }
  0x6a   : > { %p2037_p10 = scmp.ne.s32.totalorder %s2355_s17, %s2036_s24  ;;  %s2041_s14 = sshll.u32 %s2132_s21, 4  ;;  %s2042_s14 = int_to_ptr.vmem [resolvable:$false] %s2041_s14 }
  0x6b   : > { %s2043_s16 = scalar_lea.vmem %s2042_s14, 512  ;;  %p2044_p12 = scmp.lt.s32.totalorder %s2355_s17, %s2042_s14 }
  0x6c   : > { %p2039_p3 = pnand %p2037_p10, %p2023_p9  ;;  %p2045_p1 = scmp.lt.s32.totalorder %s2043_s16, %s2036_s24 }
  0x6e   : > { %p2040_p7 = pneg %p2039_p3  ;;  %p2046_p2 = por %p2045_p1, %p2044_p12 }
  0x70   : > { %p2047_p4 = pnand %p2046_p2, %p2040_p7 }
  0x72   : > { %2050 = shalt.err (!%p2047_p4)
}
  0x73   : > { %s2133_s27 = smov 128   ;;  %s2134_s12 = smov 8  }
  0x74   : > { %1801 = dma.hbm_to_vmem [thread:$0]  (!%p2351_p11), %s2349_s10, 256, %s2355_s17, %s2357_s18, %s2133_s27, %s2133_s27, %s2134_s12  }
  0x75   : > { %p2533_p9 = scmp.ne.s32.totalorder %s2527_s13, 0 }
  0x76   : > { %s2388_s25 = sand.u32 (!%p2533_p9), 1, %s2117_s28   ;;  %p2534_p0 = scmp.ne.s32.totalorder (!%p2533_p9), %s2524_s11, 0 }
  0x77   : > { %317 = sbr.rel (%p2533_p9) target bundleno = 669 (0x29d), region = 52  ;;  %s1530_s20 = sshll.u32 (!%p2533_p9), %s2388_s25, 4 }
  0x78   : > { %s320_s19 = scalar_lea.sflag (!%p2533_p9), [#allocation5], %s2388_s25  ;;  %s2394_s24 = scalar_lea.vmem (!%p2533_p9), [#allocation4], %s1530_s20 }
  0x7e   : > { %2096 = dma.done.wait (%p2534_p0), %s320_s19, 256  }
  0x7f   : > { %2098 = vsyncadd (%p2534_p0), %s320_s19, 4294967040  ;;  %p2535_p11 = scmp.eq.s32.totalorder %s2207_s9, 0 }
  0x81   : > { %2100 = dma.done.wait (%p2535_p11), [#allocation8], 9216   ;;  %p2536_p8 = pmov %p2535_p11 }
  0x83   : > { %2102 = vsyncadd (%p2536_p8), [#allocation8], 4294958080  ;;  %p2537_p13 = pmov %p2536_p8 }
  0x84   : > { %p2538_p6 = pmov %p2536_p8 }
  0x85   : > { %2104 = dma.done.wait (%p2537_p13), [#allocation11], 1024  }
  0x86   : > { %2106 = vsyncadd (%p2538_p6), [#allocation11], 4294966272  ;;  %vm393_vm0 = vcmask 1048064   ;;  %vm396_vm1 = vcmask 1041920   ;;  %v2135_v0 = vmov 0.0   ;;  %vm2136_vm2 = vmmov 0  }
  0x87   : > { %1732 = vmatprep.subr.bf16.mxu1 %v2135_v0  ;;  %391 = vst [vmem:[#allocation2] sm:$0x1] %v2135_v0  ;;  %392 = vst [vmem:[#allocation2 + $0x11] sm:$0x1] %v2135_v0  ;;  %1748 = vmatprep.mubr.msk.bf16.mxu1 %vm2136_vm2, %v2135_v0  ;;  %v1857_v1 = vld [vmem:[#allocation7 + $0x40] sm:$0xff]   ;;  %v1860_v4 = vld [vmem:[#allocation7 + $0x48] sm:$0xff]  }
  0x88   : > { %395 = vst.msk [vmem:[#allocation2 + $0x8] sm:$0xff] %vm393_vm0, %v2135_v0  ;;  %394 = vst.msk [vmem:[#allocation2] sm:$0xff] %vm393_vm0, %v2135_v0  ;;  %v1858_v2 = vld [vmem:[#allocation7] sm:$0xff]   ;;  %1626 = vmatprep.subr.bf16.mxu0 %v1857_v1  ;;  %v1861_v5 = vld [vmem:[#allocation7 + $0x8] sm:$0xff]   ;;  %vm398_vm3 = vcmask 523264   ;;  %vm718_vm6 = vcmask 1040384  }
  0x89   : > { %397 = vst.msk [vmem:[#allocation2 + $0x10] sm:$0x3] %vm396_vm1, %v2135_v0  ;;  %v1859_v3 = vld [vmem:[#allocation7 + $0x80] sm:$0xff]   ;;  %1627 = vmatpush3.bf16.msra.mxu0 %v1858_v2  ;;  %v1862_v6 = vld [vmem:[#allocation7 + $0x88] sm:$0xff]   ;;  %v1863_v7 = vld [vmem:[#allocation7 + $0x50] sm:$0xff]   ;;  %vm781_vm7 = vcmask 1046528  }
  0x8a   : > { %1733 = vmatpush3.bf16.msra.mxu1 %v1859_v3  ;;  %1628 = vmatprep.subr.bf16.mxu0 %v1860_v4  ;;  %v1864_v8 = vld [vmem:[#allocation7 + $0x10] sm:$0xff]   ;;  %v1866_v10 = vld [vmem:[#allocation7 + $0x58] sm:$0xff]   ;;  %v1869_v13 = vld [vmem:[#allocation7 + $0x60] sm:$0xff]   ;;  %vm750_vm5 = vsmask.f32 7424  ;;  %s367_s16 = scalar_lea.vmem [#allocation12], %s1530_s20 }
  0x8b   : > { %1734 = vmatprep.subr.bf16.mxu1 %v2135_v0  ;;  %v1865_v9 = vld [vmem:[#allocation7 + $0x90] sm:$0xff]   ;;  %v1867_v11 = vld [vmem:[#allocation7 + $0x18] sm:$0xff]   ;;  %v1870_v14 = vld [vmem:[#allocation7 + $0x20] sm:$0xff]   ;;  %s1418_s27 = sshll.u32 %s367_s16, 4  ;;  %s1625_s12 = sshll.u32 %s2207_s9, 8  ;;  %s2460_s27 = int_to_ptr.vmem [resolvable:$true] %s1418_s27 }
  0x8c   : > { %v1868_v12 = vld [vmem:[#allocation7 + $0x98] sm:$0xff]   ;;  %v1871_v15 = vld [vmem:[#allocation7 + $0xa0] sm:$0xff]   ;;  %v1872_v16 = vld [vmem:[#allocation7 + $0x68] sm:$0xff]   ;;  %s2465_s11 = scalar_lea.hbm %s2517_s8, %s1625_s12  ;;  %s1405_s20 = scalar_lea.sflag [#allocation6], %s2388_s25 }
  0x8d   : > { %1629 = vmatpush3.bf16.msra.mxu0 %v1861_v5  ;;  %v1873_v17 = vld [vmem:[#allocation7 + $0x28] sm:$0xff]   ;;  %v1875_v19 = vld [vmem:[#allocation7 + $0x70] sm:$0xff]   ;;  %v1878_v22 = vld [vmem:[#allocation7 + $0x78] sm:$0xff]   ;;  %s2051_s13 = scalar_lea.vmem %s2460_s27, 256  ;;  %s2138_s9 = smov [#allocation12]  }
  0x8e   : > { %1735 = vmatpush3.bf16.msra.mxu1 %v1862_v6  ;;  %1630 = vmatprep.subr.bf16.mxu0 %v1863_v7  ;;  %v1874_v18 = vld [vmem:[#allocation7 + $0xa8] sm:$0xff]   ;;  %v1876_v20 = vld [vmem:[#allocation7 + $0x30] sm:$0xff]   ;;  %v1535_v25 = vld [vmem:[%s2510_s1] ss:$0 sm:$0xff]  ;;  %v704_v7 = vlaneseq  ;;  %p2052_p10 = scmp.ne.s32.totalorder %s2460_s27, %s2051_s13  ;;  %s2055_s10 = sshll.u32 %s2138_s9, 4  ;;  %s2056_s10 = int_to_ptr.vmem [resolvable:$false] %s2055_s10 }
  0x8f   : > { %1736 = vmatprep.subr.bf16.mxu1 %v2135_v0  ;;  %v1877_v21 = vld [vmem:[#allocation7 + $0xb0] sm:$0xff]   ;;  %v370_v24 = vld [vmem:[%s2394_s24 + $0x8] sm:$0xff]  ;;  %v1887_v35 = vld [vmem:[#allocation9 + $0x40] sm:$0xff]   ;;  %s2057_s17 = scalar_lea.vmem %s2056_s10, 512  ;;  %p2058_p12 = scmp.lt.s32.totalorder %s2460_s27, %s2056_s10 }
  0x90   : > { %v369_v23 = vld [vmem:[%s2394_s24] sm:$0xff]  ;;  %v379_v27 = vmul.f32 %v1535_v25, %v370_v24  ;;  %v1536_v28 = vld [vmem:[%s2511_s2] ss:$0 sm:$0xff]  ;;  %v1890_v41 = vld [vmem:[#allocation9 + $0x48] sm:$0xff]   ;;  %vm706_vm4 = vcmp.lt.s32.totalorder %v704_v7, 256  ;;  %p2053_p3 = pnand %p2052_p10, %p2340_p5  ;;  %p2059_p1 = scmp.lt.s32.totalorder %s2057_s17, %s2051_s13 }
  0x91   : > { %1631 = vmatpush3.bf16.msra.mxu0 %v1864_v8  ;;  %v378_v26 = vmul.f32 %v1535_v25, %v369_v23  ;;  %v1879_v29 = vld [vmem:[#allocation7 + $0x38] sm:$0xff]   ;;  %v1881_v36 = vld [vmem:[#allocation10] sm:$0xff]   ;;  %v1882_v48 = vld [vmem:[#allocation10 + $0x8] sm:$0xff]   ;;  %708 = vst.msk [vmem:[#allocation3] ss:$8 sm:$0x3] %vm706_vm4, %v2135_v0 }
  0x92   : > { %1737 = vmatpush3.bf16.msra.mxu1 %v1865_v9  ;;  %1632 = vmatprep.subr.bf16.mxu0 %v1866_v10  ;;  %v388_v31 = vadd.f32 %v1536_v28, %v379_v27  ;;  %v1880_v32 = vld [vmem:[#allocation7 + $0xb8] sm:$0xff]   ;;  %v1889_v37 = vld [vmem:[#allocation9] sm:$0xff]   ;;  %v1892_v49 = vld [vmem:[#allocation9 + $0x8] sm:$0xff]   ;;  %711 = vst.msk [vmem:[#allocation3 + $0x21] ss:$8 sm:$0x3] %vm706_vm4, %v2135_v0  ;;  %p2054_p7 = pneg %p2053_p3  ;;  %p2060_p2 = por %p2059_p1, %p2058_p12 }
  0x93   : > { %1738 = vmatprep.subr.bf16.mxu1 %v2135_v0  ;;  %v387_v30 = vadd.f32 %v1536_v28, %v378_v26  ;;  %v1883_v50 = vld [vmem:[#allocation10 + $0x10] sm:$0xff]   ;;  %v1884_v51 = vld [vmem:[#allocation10 + $0x18] sm:$0xff]   ;;  %v1885_v52 = vld [vmem:[#allocation10 + $0x20] sm:$0xff]   ;;  %713 = vst [vmem:[#allocation3 + $0x8] sm:$0xff] %v2135_v0 }
  0x94   : > { %v390_v34 = vmax.f32 %v388_v31, 0.0  ;;  %v1886_v53 = vld [vmem:[#allocation10 + $0x28] sm:$0xff]   ;;  %v1888_v54 = vld [vmem:[#allocation10 + $0x30] sm:$0xff]   ;;  %v1891_v55 = vld [vmem:[#allocation10 + $0x38] sm:$0xff]   ;;  %715 = vst [vmem:[#allocation3 + $0x28] sm:$0x3] %v2135_v0  ;;  %p2061_p4 = pnand %p2060_p2, %p2054_p7 }
  0x95   : > { %1633 = vmatpush3.bf16.msra.mxu0 %v1867_v11  ;;  %v389_v33 = vmax.f32 %v387_v30, 0.0  ;;  %v1893_v56 = vld [vmem:[#allocation9 + $0x50] sm:$0xff]   ;;  %v1894_v57 = vld [vmem:[#allocation9 + $0xc0] sm:$0xff]   ;;  %v1897_v60 = vld [vmem:[#allocation9 + $0x58] sm:$0xff]  }
  0x96   : > { %1739 = vmatpush3.bf16.msra.mxu1 %v1868_v12  ;;  %1634 = vmatprep.subr.bf16.mxu0 %v1869_v13  ;;  %400 = vst.msk [vmem:[#allocation2 + $0x9] sm:$0xff] %vm398_vm3, %v390_v34  ;;  %v1895_v58 = vld [vmem:[#allocation9 + $0x10] sm:$0xff]   ;;  %v1896_v59 = vld [vmem:[#allocation9 + $0x80] sm:$0xff]   ;;  %v1898_v61 = vld [vmem:[#allocation9 + $0xc8] sm:$0xff]  }
  0x97   : > { %1740 = vmatprep.subr.bf16.mxu1 %v2135_v0  ;;  %399 = vst.msk [vmem:[#allocation2 + $0x1] sm:$0xff] %vm398_vm3, %v389_v33  ;;  %v1899_v62 = vld [vmem:[#allocation9 + $0x18] sm:$0xff]   ;;  %v1900_v63 = vld [vmem:[#allocation9 + $0x88] sm:$0xff]   ;;  %v1901_v1 = vld [vmem:[#allocation9 + $0x60] sm:$0xff]  }
  0x98   : > { %v1902_v2 = vld [vmem:[#allocation9 + $0xd0] sm:$0xff]   ;;  %v1903_v3 = vld [vmem:[#allocation9 + $0x20] sm:$0xff]   ;;  %v1905_v5 = vld [vmem:[#allocation9 + $0x68] sm:$0xff]  }
  0x99   : > { %1635 = vmatpush3.bf16.msra.mxu0 %v1870_v14  ;;  %v1904_v4 = vld [vmem:[#allocation9 + $0x90] sm:$0xff]   ;;  %v1906_v6 = vld [vmem:[#allocation9 + $0xd8] sm:$0xff]   ;;  %v1907_v8 = vld [vmem:[#allocation9 + $0x28] sm:$0xff]  }
  0x9a   : > { %1741 = vmatpush3.bf16.msra.mxu1 %v1871_v15  ;;  %1636 = vmatprep.subr.bf16.mxu0 %v1872_v16  ;;  %v1908_v9 = vld [vmem:[#allocation9 + $0x98] sm:$0xff]   ;;  %v1909_v10 = vld [vmem:[#allocation9 + $0x70] sm:$0xff]   ;;  %v1910_v11 = vld [vmem:[#allocation9 + $0xe0] sm:$0xff]  }
  0x9b   : > { %1742 = vmatprep.subr.bf16.mxu1 %v2135_v0  ;;  %v1911_v12 = vld [vmem:[#allocation9 + $0x30] sm:$0xff]   ;;  %v1912_v13 = vld [vmem:[#allocation9 + $0xa0] sm:$0xff]   ;;  %v1913_v14 = vld [vmem:[#allocation9 + $0x78] sm:$0xff]  }
  0x9c   : > { %v1914_v15 = vld [vmem:[#allocation9 + $0xe8] sm:$0xff]   ;;  %v1915_v16 = vld [vmem:[#allocation9 + $0x38] sm:$0xff]   ;;  %v1919_v23 = vld [vmem:[#allocation9 + $0xb0] sm:$0xff]  }
  0x9d   : > { %1637 = vmatpush3.bf16.msra.mxu0 %v1873_v17  ;;  %v405_v39 = vld [vmem:[#allocation2 + $0x9] sm:$0xff]  ;;  %v737_v24 = vld [vmem:[#allocation3 + $0x28] sm:$0x1] }
  0x9e   : > { %1743 = vmatpush3.bf16.msra.mxu1 %v1874_v18  ;;  %1638 = vmatprep.subr.bf16.mxu0 %v1875_v19  ;;  %v404_v38 = vld [vmem:[#allocation2 + $0x1] sm:$0xff]  ;;  %v408_v45 = vld [vmem:[#allocation2 + $0xa] sm:$0xff]  ;;  %v1917_v18 = vld [vmem:[#allocation9 + $0xf0] sm:$0xff]   ;;  %v741_v25 = vpack.c.bf16 %v737_v24, %v737_v24 }
  0x9f   : > { %1744 = vmatprep.subr.bf16.mxu1 %v2135_v0  ;;  %v401_v40 = vld [vmem:[#allocation2] sm:$0xff]  ;;  %v406_v42 = vpack.c.bf16 %v405_v39, %v404_v38  ;;  %v402_v43 = vld [vmem:[#allocation2 + $0x8] sm:$0xff]  ;;  %v1916_v17 = vld [vmem:[#allocation9 + $0xa8] sm:$0xff]  }
  0xa0   : > { %v407_v44 = vld [vmem:[#allocation2 + $0x2] sm:$0xff]  ;;  %v403_v46 = vpack.c.bf16 %v402_v43, %v401_v40  ;;  %v771_v31 = vshll.u32 %v741_v25, 16 }
  0xa1   : > { %1639 = vmatpush3.bf16.msra.mxu0 %v1876_v20  ;;  %v409_v47 = vpack.c.bf16 %v408_v45, %v407_v44  ;;  %634 = vmatprep.mubr.bf16.mxu0 %v406_v42  ;;  %v1918_v19 = vld [vmem:[#allocation9 + $0x140] sm:$0xff]   ;;  %v735_v20 = vld [vmem:[#allocation3 + $0x8] sm:$0xfe] }
  0xa2   : > { %1745 = vmatpush3.bf16.msra.mxu1 %v1877_v21  ;;  %1640 = vmatprep.subr.bf16.mxu0 %v1878_v22  ;;  %v739_v21 = vpack.c.bf16 %v2135_v0, %v735_v20  ;;  %v2137_v22 = vmov 0.0|0.0   ;;  %v1921_v27 = vld [vmem:[#allocation9 + $0xf8] sm:$0xff]   ;;  %v773_v33 = vrot.slane %v771_v31, 1  ;;  %v1934_v31 = vld [vmem:[#allocation9 + $0x130] sm:$0xff]  }
  0xa3   : > { %1746 = vmatprep.subr.bf16.mxu1 %v2135_v0  ;;  %v1923_v28 = vld [vmem:[#allocation9 + $0xb8] sm:$0xff]  }
  0xa4   : > { %v766_v26 = vshll.u32 %v739_v21, 16 }
  0xa5   : > { %1641 = vmatpush3.bf16.msra.mxu0 %v1879_v29  ;;  %v764_v29 = vshrl.u32 %v739_v21, 16  ;;  %v1928_v21 = vld [vmem:[#allocation9 + $0x118] sm:$0xff]  }
  0xa6   : > { %1747 = vmatpush3.bf16.msra.mxu1 %v1880_v32  ;;  %1752 = vmatprep.subr.bf16.mxu0 %v2135_v0  ;;  %v768_v30 = vrot.slane %v766_v26, 1  ;;  %v1930_v26 = vld [vmem:[#allocation9 + $0x120] sm:$0xff]  }
  0xa7   : > { %1666 = vmatprep.subr.bf16.mxu1 %v1887_v35 }
  0xa8   : > { %635 = vmatmul.mubr.bf16.vlgmr.msra.gmra.mrb[0].mxu0 %v403_v46  ;;  %v769_v32 = vor.u32 %v768_v30, %v764_v29  ;;  %v1933_v29 = vld [vmem:[#allocation9 + $0x170] sm:$0xff]  }
  0xa9   : > { %1749 = vmatmul.mubr.bf16.vlgmr.msra.gmra.mrb[0].mxu1 %v409_v47  ;;  %1753 = vmatpush3.bf16.msra.mxu0 %v1881_v36  ;;  %v1562_v47 = vld [vmem:[%s2514_s5] ss:$0 sm:$0xff] }
  0xaa   : > { %1667 = vmatpush3.bf16.msra.mxu1 %v1889_v37  ;;  %1754 = vmatprep.subr.bf16.mxu0 %v2135_v0  ;;  %v774_v34 = vsel %vm750_vm5, %v769_v32, %v773_v33  ;;  %v1935_v32 = vld [vmem:[#allocation9 + $0x178] sm:$0xff]  }
  0xab   : > { %1668 = vmatprep.subr.bf16.mxu1 %v1890_v41  ;;  %1768 = vmatprep.mubr.msk.bf16.mxu0 %vm2136_vm2, %v2135_v0 }
  0xac   : > { %1311 = vmatprep.mubr.bf16.mxu1 %v2137_v22 }
  0xad   : > { %1755 = vmatpush3.bf16.msra.mxu0 %v1882_v48 }
  0xae   : > { %1669 = vmatpush3.bf16.msra.mxu1 %v1892_v49  ;;  %1756 = vmatprep.subr.bf16.mxu0 %v2135_v0 }
  0xaf   : > { %1670 = vmatprep.subr.bf16.mxu1 %v1893_v56 }
  0xb1   : > { %1757 = vmatpush3.bf16.msra.mxu0 %v1883_v50 }
  0xb2   : > { %1758 = vmatprep.subr.bf16.mxu0 %v2135_v0  ;;  %1671 = vmatpush3.bf16.msra.mxu1 %v1895_v58 }
  0xb3   : > { %1672 = vmatprep.subr.bf16.mxu1 %v1897_v60 }
  0xb5   : > { %1759 = vmatpush3.bf16.msra.mxu0 %v1884_v51 }
  0xb6   : > { %1760 = vmatprep.subr.bf16.mxu0 %v2135_v0  ;;  %1673 = vmatpush3.bf16.msra.mxu1 %v1899_v62 }
  0xb7   : > { %1674 = vmatprep.subr.bf16.mxu1 %v1901_v1 }
  0xb9   : > { %1761 = vmatpush3.bf16.msra.mxu0 %v1885_v52 }
  0xba   : > { %1762 = vmatprep.subr.bf16.mxu0 %v2135_v0  ;;  %1675 = vmatpush3.bf16.msra.mxu1 %v1903_v3 }
  0xbb   : > { %1676 = vmatprep.subr.bf16.mxu1 %v1905_v5  ;;  %v1922_v5 = vld [vmem:[#allocation9 + $0x148] sm:$0xff]  }
  0xbd   : > { %1763 = vmatpush3.bf16.msra.mxu0 %v1886_v53 }
  0xbe   : > { %1764 = vmatprep.subr.bf16.mxu0 %v2135_v0  ;;  %1677 = vmatpush3.bf16.msra.mxu1 %v1907_v8 }
  0xbf   : > { %1678 = vmatprep.subr.bf16.mxu1 %v1909_v10 }
  0xc1   : > { %1765 = vmatpush3.bf16.msra.mxu0 %v1888_v54  ;;  %v743_v54 = vld [vmem:[#allocation3 + $0x8] sm:$0xfc] }
  0xc2   : > { %1766 = vmatprep.subr.bf16.mxu0 %v2135_v0  ;;  %1679 = vmatpush3.bf16.msra.mxu1 %v1911_v12 }
  0xc3   : > { %1680 = vmatprep.subr.bf16.mxu1 %v1913_v14  ;;  %v1925_v14 = vld [vmem:[#allocation9 + $0x150] sm:$0xff]  }
  0xc5   : > { %1767 = vmatpush3.bf16.msra.mxu0 %v1891_v55  ;;  %v745_v55 = vld [vmem:[#allocation3 + $0x28] sm:$0x3] }
  0xc6   : > { %1688 = vmatprep.subr.bf16.mxu0 %v1894_v57  ;;  %1681 = vmatpush3.bf16.msra.mxu1 %v1915_v16  ;;  %v749_v60 = vpack.c.bf16 %v745_v55, %v745_v55 }
  0xc7   : > { %1710 = vmatprep.subr.bf16.mxu1 %v1918_v19  ;;  %v1927_v19 = vld [vmem:[#allocation9 + $0x158] sm:$0xff]  }
  0xc8   : > { %1769 = vmatmul.mubr.bf16.vlgmr.msra.gmra.mrb[4].mxu0 %v406_v42  ;;  %v1561_v42 = vld [vmem:[%s2513_s4] ss:$0 sm:$0xff] }
  0xc9   : > { %1689 = vmatpush3.bf16.msra.mxu0 %v1896_v59  ;;  %1352 = vmatprep.mubr.bf16.mxu0 %v774_v34  ;;  %v747_v59 = vpack.c.bf16 %v2135_v0, %v743_v54  ;;  %v1924_v0 = vld [vmem:[#allocation9 + $0x108] sm:$0xff]  }
  0xca   : > { %1690 = vmatprep.subr.bf16.mxu0 %v1898_v61 }
  0xcb   : > { %v785_v62 = vrot.slane %v747_v59, 1 }
  0xcd   : > { %1691 = vmatpush3.bf16.msra.mxu0 %v1900_v63  ;;  %v786_v63 = vrot.slane %v749_v60, 1 }
  0xce   : > { %1692 = vmatprep.subr.bf16.mxu0 %v1902_v2  ;;  %v1920_v2 = vld [vmem:[#allocation9 + $0x100] sm:$0xff]  }
  0xcf   : > { %v787_v7 = vsel %vm781_vm7, %v785_v62, %v786_v63 }
  0xd1   : > { %1693 = vmatpush3.bf16.msra.mxu0 %v1904_v4 }
  0xd2   : > { %1694 = vmatprep.subr.bf16.mxu0 %v1906_v6 }
  0xd5   : > { %1695 = vmatpush3.bf16.msra.mxu0 %v1908_v9 }
  0xd6   : > { %1696 = vmatprep.subr.bf16.mxu0 %v1910_v11 }
  0xd9   : > { %1697 = vmatpush3.bf16.msra.mxu0 %v1912_v13 }
  0xda   : > { %1698 = vmatprep.subr.bf16.mxu0 %v1914_v15 }
  0xdd   : > { %1699 = vmatpush3.bf16.msra.mxu0 %v1916_v17  ;;  %v1926_v17 = vld [vmem:[#allocation9 + $0x110] sm:$0xff]  }
  0xde   : > { %1700 = vmatprep.subr.bf16.mxu0 %v1917_v18 }
  0xe1   : > { %1701 = vmatpush3.bf16.msra.mxu0 %v1919_v23  ;;  %v1929_v23 = vld [vmem:[#allocation9 + $0x160] sm:$0xff]  }
  0xe2   : > { %1702 = vmatprep.subr.bf16.mxu0 %v1921_v27  ;;  %v1931_v27 = vld [vmem:[#allocation9 + $0x168] sm:$0xff]  }
  0xe5   : > { %1703 = vmatpush3.bf16.msra.mxu0 %v1923_v28  ;;  %v1932_v28 = vld [vmem:[#allocation9 + $0x128] sm:$0xff]  }
 0x17b   : > { %v1642_v35 = vpop.f32.mrb[0].mxu0 }
 0x17c   : > { %v677_v36 = vpop.f32.mrb[0].mxu1  ;;  %v1643_v37 = vpop.f32.mrb[1].mxu0 }
 0x17d   : > { %v1750_v38 = vpop.f32.mrb[1].mxu1  ;;  %v1644_v39 = vadd.f32 %v1643_v37, %v1642_v35  ;;  %v1645_v40 = vpop.f32.mrb[2].mxu0  ;;  %v1936_v35 = vld [vmem:[#allocation9 + $0x138] sm:$0xff]  }
 0x17e   : > { %v680_v41 = vpop.f32.mrb[2].mxu1  ;;  %v1646_v43 = vpop.f32.mrb[3].mxu0 }
 0x17f   : > { %v1751_v44 = vpop.f32.mrb[3].mxu1  ;;  %v678_v45 = vadd.f32 %v1644_v39, %v677_v36  ;;  %v1647_v46 = vadd.f32 %v1646_v43, %v1645_v40 }
 0x181   : > { %v691_v48 = vmul.f32 %v1561_v42, %v678_v45  ;;  %v681_v49 = vadd.f32 %v1647_v46, %v680_v41 }
 0x183   : > { %v700_v50 = vadd.f32 %v1562_v47, %v691_v48  ;;  %v692_v51 = vmul.f32 %v1561_v42, %v681_v49 }
 0x185   : > { %v702_v52 = vmax.f32 %v700_v50, 0.0  ;;  %v701_v53 = vadd.f32 %v1562_v47, %v692_v51 }
 0x187   : > { %v719_v56 = vrot.slane %v702_v52, 7  ;;  %v703_v57 = vmax.f32 %v701_v53, 0.0 }
 0x189   : > { %725 = vst [vmem:[#allocation3] sm:$0xfe] %v719_v56  ;;  %v720_v58 = vrot.slane %v703_v57, 7 }
 0x18b   : > { %v721_v61 = vsel %vm718_vm6, %v719_v56, %v720_v58  ;;  %727 = vst [vmem:[#allocation3 + $0x20] sm:$0x1] %v720_v58 }
 0x190   : > { %v728_v1 = vld [vmem:[#allocation3] sm:$0xff] }
 0x191   : > { %v734_v3 = vld [vmem:[#allocation3] sm:$0xfe]  ;;  %v732_v4 = vpack.c.bf16 %v721_v61, %v728_v1 }
 0x192   : > { %v738_v6 = vpack.c.bf16 %v721_v61, %v734_v3  ;;  %v736_v8 = vld [vmem:[#allocation3 + $0x20] sm:$0x1]  ;;  %v742_v33 = vld [vmem:[#allocation3] sm:$0xfc] }
 0x193   : > { %1312 = vmatmul.mubr.bf16.vlgmr.msra.gmra.mrb[4].mxu1 %v732_v4  ;;  %v740_v9 = vpack.c.bf16 %v736_v8, %v736_v8  ;;  %v744_v30 = vld [vmem:[#allocation3 + $0x20] sm:$0x3]  ;;  %v746_v36 = vpack.c.bf16 %v721_v61, %v742_v33 }
 0x194   : > { %v754_v10 = vshll.u32 %v738_v6, 16  ;;  %1711 = vmatpush3.bf16.msra.mxu1 %v1920_v2  ;;  %1393 = vmatprep.mubr.bf16.mxu1 %v787_v7  ;;  %v752_v11 = vshrl.u32 %v738_v6, 16  ;;  %v748_v34 = vpack.c.bf16 %v744_v30, %v744_v30 }
 0x195   : > { %1712 = vmatprep.subr.bf16.mxu1 %v1922_v5  ;;  %v759_v13 = vshll.u32 %v740_v9, 16  ;;  %v782_v38 = vrot.slane %v746_v36, 1 }
 0x196   : > { %v756_v12 = vrot.slane %v754_v10, 1  ;;  %v783_v37 = vrot.slane %v748_v34, 1 }
 0x197   : > { %v761_v16 = vrot.slane %v759_v13, 1 }
 0x198   : > { %v757_v15 = vor.u32 %v756_v12, %v752_v11  ;;  %1713 = vmatpush3.bf16.msra.mxu1 %v1924_v0  ;;  %v784_v39 = vsel %vm781_vm7, %v782_v38, %v783_v37 }
 0x199   : > { %1714 = vmatprep.subr.bf16.mxu1 %v1925_v14 }
 0x19a   : > { %v762_v18 = vsel %vm750_vm5, %v757_v15, %v761_v16 }
 0x19b   : > { %1353 = vmatmul.mubr.bf16.vlgmr.msra.gmra.mrb[8].mxu0 %v762_v18  ;;  %v984_v20 = vpop.f32.mrb[4].mxu0 }
 0x19c   : > { %1715 = vmatpush3.bf16.msra.mxu1 %v1926_v17  ;;  %v1770_v22 = vpop.f32.mrb[5].mxu0 }
 0x19d   : > { %1716 = vmatprep.subr.bf16.mxu1 %v1927_v19  ;;  %v987_v24 = vpop.f32.mrb[6].mxu0 }
 0x19e   : > { %v1771_v25 = vpop.f32.mrb[7].mxu0 }
 0x1a0   : > { %1717 = vmatpush3.bf16.msra.mxu1 %v1928_v21 }
 0x1a1   : > { %1718 = vmatprep.subr.bf16.mxu1 %v1929_v23 }
 0x1a4   : > { %1719 = vmatpush3.bf16.msra.mxu1 %v1930_v26 }
 0x1a5   : > { %1720 = vmatprep.subr.bf16.mxu1 %v1931_v27 }
 0x1a8   : > { %1721 = vmatpush3.bf16.msra.mxu1 %v1932_v28 }
 0x1a9   : > { %1722 = vmatprep.subr.bf16.mxu1 %v1933_v29 }
 0x1ac   : > { %1723 = vmatpush3.bf16.msra.mxu1 %v1934_v31 }
 0x1ad   : > { %1724 = vmatprep.subr.bf16.mxu1 %v1935_v32 }
 0x1b0   : > { %1725 = vmatpush3.bf16.msra.mxu1 %v1936_v35 }
 0x1b3   : > { %1394 = vmatmul.mubr.bf16.vlgmr.msra.gmra.mrb[8].mxu1 %v784_v39 }
 0x266   : > { %v1682_v40 = vpop.f32.mrb[4].mxu1 }
 0x267   : > { %v1683_v41 = vpop.f32.mrb[5].mxu1 }
 0x268   : > { %v1684_v42 = vadd.f32 %v1683_v41, %v1682_v40  ;;  %v1685_v43 = vpop.f32.mrb[6].mxu1 }
 0x269   : > { %v1686_v44 = vpop.f32.mrb[7].mxu1 }
 0x26a   : > { %v1314_v45 = vadd.f32 %v1684_v42, %v984_v20  ;;  %v1687_v46 = vadd.f32 %v1686_v44, %v1685_v43 }
 0x26c   : > { %v1317_v47 = vadd.f32 %v1687_v46, %v987_v24 }
 0x26e   : > { %v1704_v48 = vpop.f32.mrb[8].mxu0 }
 0x26f   : > { %v1705_v49 = vpop.f32.mrb[9].mxu0 }
 0x270   : > { %v1706_v50 = vadd.f32 %v1705_v49, %v1704_v48  ;;  %v1707_v51 = vpop.f32.mrb[10].mxu0 }
 0x271   : > { %v1708_v52 = vpop.f32.mrb[11].mxu0 }
 0x272   : > { %v1355_v53 = vadd.f32 %v1706_v50, %v1314_v45  ;;  %v1709_v54 = vadd.f32 %v1708_v52, %v1707_v51 }
 0x274   : > { %v1358_v55 = vadd.f32 %v1709_v54, %v1317_v47 }
 0x286   : > { %v1726_v56 = vpop.f32.mrb[8].mxu1 }
 0x287   : > { %v1727_v57 = vpop.f32.mrb[9].mxu1 }
 0x288   : > { %v1728_v58 = vadd.f32 %v1727_v57, %v1726_v56  ;;  %v1729_v59 = vpop.f32.mrb[10].mxu1 }
 0x289   : > { %v1730_v60 = vpop.f32.mrb[11].mxu1 }
 0x28a   : > { %v1396_v61 = vadd.f32 %v1728_v58, %v1355_v53  ;;  %v1731_v62 = vadd.f32 %v1730_v60, %v1729_v59 }
 0x28c   : > { %1402 = vst [vmem:[%s367_s16] sm:$0xff] %v1396_v61  ;;  %v1399_v63 = vadd.f32 %v1731_v62, %v1358_v55 }
 0x28e   : > { %1403 = vst [vmem:[%s367_s16 + $0x8] sm:$0xff] %v1399_v63 }
 0x28f   : > { %2064 = shalt.err (!%p2061_p4)
}
 0x290   : > { %s2065_s15 = scalar_lea.hbm %s2465_s11, 256  ;;  %s2069_s14 = scalar_lea.hbm %s2517_s8, 512 }
 0x291   : > { %p2066_p9 = scmp.ne.s32.totalorder %s2465_s11, %s2065_s15  ;;  %p2070_p8 = scmp.lt.u32.totalorder %s2465_s11, %s2517_s8 }
 0x292   : > { %p2071_p13 = scmp.lt.u32.totalorder %s2069_s14, %s2065_s15  ;;  %p2073_p10 = scmp.lt.u32.totalorder %s2065_s15, %s2465_s11 }
 0x293   : > { %p2067_p0 = pnand %p2066_p9, %p2340_p5 }
 0x294   : > { %p2072_p6 = por %p2071_p13, %p2070_p8 }
 0x295   : > { %p2068_p11 = pneg %p2067_p0 }
 0x296   : > { %p2074_p3 = por %p2073_p10, %p2072_p6 }
 0x298   : > { %p2075_p7 = pnand %p2074_p3, %p2068_p11 }
 0x29a   : > { %2078 = shalt.err (!%p2075_p7)
}
 0x29b   : > { %s2139_s19 = smov 128   ;;  %s2140_s24 = smov 8  }
 0x29c   : > { %1786 = dma.vmem_to_hbm [thread:$0]  (%p2340_p5), %s2460_s27, 256, %s2465_s11, %s1405_s20, %s2139_s19, %s2139_s19, %s2140_s24  }
 0x29d PF: > { %s2539_s13 = sld [smem:[#allocation17_spill]]  ;;  %s2540_s9 = sld [smem:[#allocation18_spill]] }
 0x29e   : > { %p2542_p1 = scmp.ge.s32.totalorder %s2125_s30, 2 }
 0x2a3   : > { %s1433_s10 = sand.u32 1, %s2539_s13   ;;  %p2541_p12 = scmp.ne.s32.totalorder %s2540_s9, 0 }
 0x2a4   : > { %s1434_s17 = scalar_lea.sflag [#allocation6], %s1433_s10 }
 0x2a5   : > { %p1803_p2 = pnand %p2542_p1, %p2541_p12 }
 0x2a7   : > { %2108 = dma.done.wait (!%p1803_p2), %s1434_s17, 256  }
 0x2a8   : > { %2110 = vsyncadd (!%p1803_p2), %s1434_s17, 4294967040  ;;  %p23_p4 = scmp.ge.s32.totalorder %s2326_s26, 4   ;;  %s2543_s27 = smov %s2117_s28 }
 0x2a9   : > { %s2544_s28 = smov %s2121_s29  ;;  %s2545_s29 = smov %s2336_s22 }
 0x2aa   : > { %s2546_s30 = smov %s2326_s26  ;;  %25 = sbr.rel (!%p23_p4) target bundleno = 7 (0x7), region = 110 }
 0x2b1   :  { %1439 = vsyncpa [#allocation5], 1 }
 0x2b2   :  { %1441 = vsyncpa [#allocation5 + $0x1], 1 }
 0x2b3   :  { %1442 = vsyncpa [#allocation8], 1 }
 0x2b4   :  { %1443 = vsyncpa [#allocation11], 1 }
 0x2b5   :  { %1444 = vsyncpa [#allocation6], 1 }
 0x2b6   :  { %1446 = vsyncpa [#allocation6 + $0x1], 1 }

</bundles_post_ra>
